<compile_context>
chip_gen: v6e
topology: v6e:2x2x1
jax: 0.10.0
libtpu: 0.0.40
codegen_flags: <defaults>
</compile_context>

<pallas_src>
import jax
import jax.numpy as jnp
from jax.experimental import pallas as pl
from jax.experimental.pallas import tpu as pltpu


# ----------------------------------------------------------------------------
# Fused kernel (one grid step == TB batch elements):
#   bert     = tanh(emb @ Wb + bb)                          (TB*S, H)
#   pooled   = adj_row @ bert            (per batch)        (TB, H)
#   gcn_cls  = relu(pooled @ Wg + bg)                       (TB, H)
#   logits   = bert[:,0] @ Wfc_top + gcn_cls @ Wfc_bot + bfc (TB, 128)  (lane-padded)
# ----------------------------------------------------------------------------
def casrel_fused_kernel(emb_ref, adj_ref, wb_ref, bb_ref, wg_ref, bg_ref,
                        wfc_top_ref, wfc_bot_ref, bfc_ref, out_ref):
    TB, S, H = emb_ref.shape

    # Synthetic BERT body: dense + tanh. bf16 MXU operands, f32 accum/epilogue
    # (v5e-safe: tanh and bias adds stay f32).
    x2d = emb_ref[...].reshape(TB * S, H)                       # bf16
    bert2d = jnp.tanh(
        jnp.dot(x2d, wb_ref[...], preferred_element_type=jnp.float32)
        + bb_ref[...])                                          # (TB*S, H) f32
    bert = bert2d.reshape(TB, S, H)
    bert_bf16 = bert.astype(jnp.bfloat16)

    bert_cls = bert[:, 0, :]                                    # (TB, H) f32

    # Reassociated GCN row 0: (adj_row @ bert) @ Wg  ==  row 0 of adj @ (bert @ Wg).
    # The (TB,1,S)@(TB,S,H) batched reduction stays an MXU op (bf16 operands).
    adj = adj_ref[...].astype(jnp.bfloat16)                     # (TB, 1, S)
    pooled = jnp.einsum('bos,bsh->boh', adj, bert_bf16,
                        preferred_element_type=jnp.float32)[:, 0, :]   # (TB, H) f32
    gcn_cls = jnp.maximum(
        jnp.dot(pooled.astype(jnp.bfloat16), wg_ref[...],
                preferred_element_type=jnp.float32) + bg_ref[...],
        0.0)                                                    # (TB, H) f32

    # Classifier on cat(bert_cls, gcn_cls): split weights, lane-padded to 128.
    logits = (jnp.dot(bert_cls.astype(jnp.bfloat16), wfc_top_ref[...],
                      preferred_element_type=jnp.float32)
              + jnp.dot(gcn_cls.astype(jnp.bfloat16), wfc_bot_ref[...],
                        preferred_element_type=jnp.float32)
              + bfc_ref[...])                                   # (TB, 128) f32
    out_ref[...] = logits                                       # lane-dense store


# ----------------------------------------------------------------------------
# Wrapper
# ----------------------------------------------------------------------------
def casrel_forward(input_ids, adj, params, *, tb=None):
    # Embedding lookup is glue (gather); table cast to bf16 halves the (B,S,H)
    # HBM round-trip for the activation.
    # TODO(synk): the gather could be fused into the kernel via scalar-prefetched
    #             input_ids + per-row DMA from the table (pl.ANY); kept as XLA glue.
    emb = jnp.take(params["emb_table"].astype(jnp.bfloat16), input_ids, axis=0)  # (B,S,H)
    B, S, H = emb.shape
    NCLS = params["w_fc"].shape[1]
    NPAD = 128  # lane-pad the tiny class dim so the final store is lane-dense

    # TB batch elements per grid step; at realistic shapes keep grid length >= 2
    # so both v7x TensorCores stay busy under dimension_semantics=("parallel",).
    if tb is None:
        tb = next(t for t in (8, 4, 2, 1) if B % t == 0)
    assert B % tb == 0
    n_steps = B // tb

    # Only row 0 of the adjacency feeds the head -> pass a (B, 1, S) slab.
    adj_row = adj[:, 0:1, :]

    # Split + zero-pad the classifier to 128 output lanes (sliced back below).
    w_fc = params["w_fc"]
    w_fc_top = (jnp.zeros((H, NPAD), jnp.float32)
                .at[:, :NCLS].set(w_fc[:H]).astype(jnp.bfloat16))
    w_fc_bot = (jnp.zeros((H, NPAD), jnp.float32)
                .at[:, :NCLS].set(w_fc[H:]).astype(jnp.bfloat16))
    b_fc_pad = jnp.zeros((1, NPAD), jnp.float32).at[:, :NCLS].set(params["b_fc"])

    out = pl.pallas_call(
        casrel_fused_kernel,
        out_shape=jax.ShapeDtypeStruct((n_steps, tb, NPAD), jnp.float32),
        grid_spec=pltpu.PrefetchScalarGridSpec(
            num_scalar_prefetch=0,
            grid=(n_steps,),
            in_specs=[
                pl.BlockSpec((tb, S, H), lambda b: (b, 0, 0)),    # emb (bf16)
                pl.BlockSpec((tb, 1, S), lambda b: (b, 0, 0)),    # adj row 0 (f32)
                pl.BlockSpec((H, H), lambda b: (0, 0)),           # w_bert (bf16)
                pl.BlockSpec((1, H), lambda b: (0, 0)),           # b_bert (f32)
                pl.BlockSpec((H, H), lambda b: (0, 0)),           # w_gcn  (bf16)
                pl.BlockSpec((1, H), lambda b: (0, 0)),           # b_gcn  (f32)
                pl.BlockSpec((H, NPAD), lambda b: (0, 0)),        # w_fc[:H] pad (bf16)
                pl.BlockSpec((H, NPAD), lambda b: (0, 0)),        # w_fc[H:] pad (bf16)
                pl.BlockSpec((1, NPAD), lambda b: (0, 0)),        # b_fc pad (f32)
            ],
            out_specs=pl.BlockSpec((pl.Squeezed(), tb, NPAD), lambda b: (b, 0, 0)),
        ),
        compiler_params=pltpu.CompilerParams(
            dimension_semantics=("parallel",),        # batch steps -> both TCs on v7x
            vmem_limit_bytes=48 * 1024 * 1024),       # headroom for TB tiles on v7x
    )(emb, adj_row,
      params["w_bert"].astype(jnp.bfloat16), params["b_bert"],
      params["w_gcn"].astype(jnp.bfloat16), params["b_gcn"],
      w_fc_top, w_fc_bot, b_fc_pad)

    return out.reshape(B, NPAD)[:, :NCLS]                        # (B, 5)


# Pure-f32 JAX reference (exact module semantics) for a sanity check.
def casrel_reference(input_ids, adj, params):
    emb = jnp.take(params["emb_table"], input_ids, axis=0)
    bert_out = jnp.tanh(jnp.einsum('bsh,hd->bsd', emb, params["w_bert"])
                        + params["b_bert"])
    xw = jnp.einsum('bsh,hd->bsd', bert_out, params["w_gcn"])
    gcn = jax.nn.relu(jnp.einsum('bst,btd->bsd', adj, xw) + params["b_gcn"])
    pooled = jnp.concatenate([bert_out[:, 0, :], gcn[:, 0, :]], axis=1)
    return pooled @ params["w_fc"] + params["b_fc"]


if __name__ == "__main__":
    B, S, H, VOCAB, NCLS = 2, 8, 32, 50, 5

    key = jax.random.PRNGKey(0)
    k_ids, k_adj, k_emb, k_wb, k_bb, k_wg, k_bg, k_wf, k_bf = jax.random.split(key, 9)

    input_ids = jax.random.randint(k_ids, (B, S), 0, VOCAB, dtype=jnp.int32)

    # Deterministic "adjacency": random edges + self-loops, row-normalized.
    a = (jax.random.uniform(k_adj, (B, S, S)) > 0.5).astype(jnp.float32)
    a = a + jnp.eye(S, dtype=jnp.float32)[None]
    adj = a / jnp.sum(a, axis=-1, keepdims=True)

    params = {
        "emb_table": 0.02 * jax.random.normal(k_emb, (VOCAB, H), jnp.float32),
        "w_bert":    0.05 * jax.random.normal(k_wb, (H, H), jnp.float32),
        "b_bert":    0.05 * jax.random.normal(k_bb, (1, H), jnp.float32),
        "w_gcn":     0.05 * jax.random.normal(k_wg, (H, H), jnp.float32),
        "b_gcn":     0.05 * jax.random.normal(k_bg, (1, H), jnp.float32),
        "w_fc":      0.05 * jax.random.normal(k_wf, (2 * H, NCLS), jnp.float32),
        "b_fc":      0.05 * jax.random.normal(k_bf, (1, NCLS), jnp.float32),
    }

    logits = jax.block_until_ready(casrel_forward(input_ids, adj, params))
    ref = jax.block_until_ready(casrel_reference(input_ids, adj, params))

    assert logits.shape == (B, NCLS), logits.shape
    # Kernel uses bf16 MXU operands with f32 accumulation (and a reassociated but
    # algebraically identical GCN reduction) -> compare against the pure-f32
    # reference with a bf16-appropriate tolerance.
    assert jnp.allclose(logits, ref, atol=2e-2, rtol=2e-2), (logits, ref)
    print("KERNEL_OK")
</pallas_src>

<mosaic_0001>
module attributes {stable_mosaic.version = 11 : i64} {
  func.func @casrel_fused_kernel(%arg0: i32, %arg1: memref<2x8x32xbf16, #tpu.memory_space<vmem>>, %arg2: memref<2x1x8xf32, #tpu.memory_space<vmem>>, %arg3: memref<32x32xbf16, #tpu.memory_space<vmem>>, %arg4: memref<1x32xf32, #tpu.memory_space<vmem>>, %arg5: memref<32x32xbf16, #tpu.memory_space<vmem>>, %arg6: memref<1x32xf32, #tpu.memory_space<vmem>>, %arg7: memref<32x128xbf16, #tpu.memory_space<vmem>>, %arg8: memref<32x128xbf16, #tpu.memory_space<vmem>>, %arg9: memref<1x128xf32, #tpu.memory_space<vmem>>, %arg10: memref<1x2x128xf32, #tpu.memory_space<vmem>>) attributes {dimension_semantics = [#tpu.dimension_semantics<parallel>], iteration_bounds = array<i64: 1>, scalar_prefetch = 0 : i64, scratch_operands = 0 : i64, tpu.core_type = #tpu.core_type<tc>, window_params = [{transform_indices = @transform_0, window_bounds = array<i64: 2, 8, 32>}, {transform_indices = @transform_1, window_bounds = array<i64: 2, 1, 8>}, {pipeline_mode = #tpu.pipeline_mode<synchronous>, transform_indices = @transform_2, window_bounds = array<i64: 32, 32>}, {pipeline_mode = #tpu.pipeline_mode<synchronous>, transform_indices = @transform_3, window_bounds = array<i64: 1, 32>}, {pipeline_mode = #tpu.pipeline_mode<synchronous>, transform_indices = @transform_4, window_bounds = array<i64: 32, 32>}, {pipeline_mode = #tpu.pipeline_mode<synchronous>, transform_indices = @transform_5, window_bounds = array<i64: 1, 32>}, {pipeline_mode = #tpu.pipeline_mode<synchronous>, transform_indices = @transform_6, window_bounds = array<i64: 32, 128>}, {pipeline_mode = #tpu.pipeline_mode<synchronous>, transform_indices = @transform_7, window_bounds = array<i64: 32, 128>}, {pipeline_mode = #tpu.pipeline_mode<synchronous>, transform_indices = @transform_8, window_bounds = array<i64: 1, 128>}, {transform_indices = @transform_9, window_bounds = array<i64: 1, 2, 128>}]} {
    %c0 = arith.constant 0 : index
    %c0_0 = arith.constant 0 : index
    %c0_1 = arith.constant 0 : index
    %0 = vector.load %arg1[%c0, %c0_0, %c0_1] : memref<2x8x32xbf16, #tpu.memory_space<vmem>>, vector<2x8x32xbf16>
    %1 = vector.shape_cast %0 : vector<2x8x32xbf16> to vector<16x32xbf16>
    %c0_2 = arith.constant 0 : index
    %c0_3 = arith.constant 0 : index
    %2 = vector.load %arg3[%c0_2, %c0_3] : memref<32x32xbf16, #tpu.memory_space<vmem>>, vector<32x32xbf16>
    %cst = arith.constant dense<0.000000e+00> : vector<16x32xf32>
    %3 = tpu.matmul %1, %2, %cst {dimension_numbers = #tpu.dot_dimension_numbers<[1], [0], [0], [1], [0, 0, 1, 1], [], []>} : vector<16x32xbf16>, vector<32x32xbf16>, vector<16x32xf32> -> vector<16x32xf32>
    %c0_4 = arith.constant 0 : index
    %c0_5 = arith.constant 0 : index
    %4 = vector.load %arg4[%c0_4, %c0_5] : memref<1x32xf32, #tpu.memory_space<vmem>>, vector<1x32xf32>
    %5 = vector.broadcast %4 : vector<1x32xf32> to vector<16x32xf32>
    %6 = arith.addf %3, %5 : vector<16x32xf32>
    %7 = math.tanh %6 : vector<16x32xf32>
    %8 = vector.shape_cast %7 : vector<16x32xf32> to vector<2x8x32xf32>
    %9 = arith.truncf %8 : vector<2x8x32xf32> to vector<2x8x32xbf16>
    %10 = vector.extract_strided_slice %8 {offsets = [0, 0, 0], sizes = [2, 1, 32], strides = [1, 1, 1]} : vector<2x8x32xf32> to vector<2x1x32xf32>
    %11 = vector.shape_cast %10 : vector<2x1x32xf32> to vector<2x32xf32>
    %c0_6 = arith.constant 0 : index
    %c0_7 = arith.constant 0 : index
    %c0_8 = arith.constant 0 : index
    %12 = vector.load %arg2[%c0_6, %c0_7, %c0_8] : memref<2x1x8xf32, #tpu.memory_space<vmem>>, vector<2x1x8xf32>
    %13 = arith.truncf %12 : vector<2x1x8xf32> to vector<2x1x8xbf16>
    "tpu.trace_start"() <{level = 10 : i32, message = "bos,bsh->boh"}> : () -> ()
    %cst_9 = arith.constant dense<0.000000e+00> : vector<2x1x32xf32>
    %14 = tpu.matmul %13, %9, %cst_9 {dimension_numbers = #tpu.dot_dimension_numbers<[2], [1], [1], [2], [0, 0, 0, 1, 1, 2], [0], [0]>} : vector<2x1x8xbf16>, vector<2x8x32xbf16>, vector<2x1x32xf32> -> vector<2x1x32xf32>
    "tpu.trace_stop"() : () -> ()
    %15 = vector.shape_cast %14 : vector<2x1x32xf32> to vector<2x32xf32>
    %16 = arith.truncf %15 : vector<2x32xf32> to vector<2x32xbf16>
    %c0_10 = arith.constant 0 : index
    %c0_11 = arith.constant 0 : index
    %17 = vector.load %arg5[%c0_10, %c0_11] : memref<32x32xbf16, #tpu.memory_space<vmem>>, vector<32x32xbf16>
    %cst_12 = arith.constant dense<0.000000e+00> : vector<2x32xf32>
    %18 = tpu.matmul %16, %17, %cst_12 {dimension_numbers = #tpu.dot_dimension_numbers<[1], [0], [0], [1], [0, 0, 1, 1], [], []>} : vector<2x32xbf16>, vector<32x32xbf16>, vector<2x32xf32> -> vector<2x32xf32>
    %c0_13 = arith.constant 0 : index
    %c0_14 = arith.constant 0 : index
    %19 = vector.load %arg6[%c0_13, %c0_14] : memref<1x32xf32, #tpu.memory_space<vmem>>, vector<1x32xf32>
    %20 = vector.broadcast %19 : vector<1x32xf32> to vector<2x32xf32>
    %21 = arith.addf %18, %20 : vector<2x32xf32>
    %cst_15 = arith.constant 0.000000e+00 : f32
    %22 = vector.broadcast %cst_15 : f32 to vector<2x32xf32>
    %23 = arith.maximumf %21, %22 : vector<2x32xf32>
    %24 = arith.truncf %11 : vector<2x32xf32> to vector<2x32xbf16>
    %c0_16 = arith.constant 0 : index
    %c0_17 = arith.constant 0 : index
    %25 = vector.load %arg7[%c0_16, %c0_17] : memref<32x128xbf16, #tpu.memory_space<vmem>>, vector<32x128xbf16>
    %cst_18 = arith.constant dense<0.000000e+00> : vector<2x128xf32>
    %26 = tpu.matmul %24, %25, %cst_18 {dimension_numbers = #tpu.dot_dimension_numbers<[1], [0], [0], [1], [0, 0, 1, 1], [], []>} : vector<2x32xbf16>, vector<32x128xbf16>, vector<2x128xf32> -> vector<2x128xf32>
    %27 = arith.truncf %23 : vector<2x32xf32> to vector<2x32xbf16>
    %c0_19 = arith.constant 0 : index
    %c0_20 = arith.constant 0 : index
    %28 = vector.load %arg8[%c0_19, %c0_20] : memref<32x128xbf16, #tpu.memory_space<vmem>>, vector<32x128xbf16>
    %cst_21 = arith.constant dense<0.000000e+00> : vector<2x128xf32>
    %29 = tpu.matmul %27, %28, %cst_21 {dimension_numbers = #tpu.dot_dimension_numbers<[1], [0], [0], [1], [0, 0, 1, 1], [], []>} : vector<2x32xbf16>, vector<32x128xbf16>, vector<2x128xf32> -> vector<2x128xf32>
    %30 = arith.addf %26, %29 : vector<2x128xf32>
    %c0_22 = arith.constant 0 : index
    %c0_23 = arith.constant 0 : index
    %31 = vector.load %arg9[%c0_22, %c0_23] : memref<1x128xf32, #tpu.memory_space<vmem>>, vector<1x128xf32>
    %32 = vector.broadcast %31 : vector<1x128xf32> to vector<2x128xf32>
    %33 = arith.addf %30, %32 : vector<2x128xf32>
    %c0_24 = arith.constant 0 : index
    %c0_25 = arith.constant 0 : index
    %c0_26 = arith.constant 0 : index
    %34 = vector.load %arg10[%c0_24, %c0_25, %c0_26] : memref<1x2x128xf32, #tpu.memory_space<vmem>>, vector<1x2x128xf32>
    %35 = vector.shape_cast %34 : vector<1x2x128xf32> to vector<2x128xf32>
    %36 = vector.shape_cast %33 : vector<2x128xf32> to vector<1x2x128xf32>
    tpu.vector_store %arg10[%c0_24, %c0_25, %c0_26], %36 {strides = array<i32>} : memref<1x2x128xf32, #tpu.memory_space<vmem>>, vector<1x2x128xf32>,
    return
  }
  func.func @transform_0(%arg0: i32) -> (i32, i32, i32) {
    %c0_i32 = arith.constant 0 : i32
    %c0_i32_0 = arith.constant 0 : i32
    %c0_i32_1 = arith.constant 0 : i32
    return %arg0, %c0_i32, %c0_i32_0 : i32, i32, i32
  }
  func.func @transform_1(%arg0: i32) -> (i32, i32, i32) {
    %c0_i32 = arith.constant 0 : i32
    %c0_i32_0 = arith.constant 0 : i32
    %c0_i32_1 = arith.constant 0 : i32
    return %arg0, %c0_i32, %c0_i32_0 : i32, i32, i32
  }
  func.func @transform_2(%arg0: i32) -> (i32, i32) {
    %c0_i32 = arith.constant 0 : i32
    %c0_i32_0 = arith.constant 0 : i32
    %c0_i32_1 = arith.constant 0 : i32
    return %c0_i32, %c0_i32_0 : i32, i32
  }
  func.func @transform_3(%arg0: i32) -> (i32, i32) {
    %c0_i32 = arith.constant 0 : i32
    %c0_i32_0 = arith.constant 0 : i32
    %c0_i32_1 = arith.constant 0 : i32
    return %c0_i32, %c0_i32_0 : i32, i32
  }
  func.func @transform_4(%arg0: i32) -> (i32, i32) {
    %c0_i32 = arith.constant 0 : i32
    %c0_i32_0 = arith.constant 0 : i32
    %c0_i32_1 = arith.constant 0 : i32
    return %c0_i32, %c0_i32_0 : i32, i32
  }
  func.func @transform_5(%arg0: i32) -> (i32, i32) {
    %c0_i32 = arith.constant 0 : i32
    %c0_i32_0 = arith.constant 0 : i32
    %c0_i32_1 = arith.constant 0 : i32
    return %c0_i32, %c0_i32_0 : i32, i32
  }
  func.func @transform_6(%arg0: i32) -> (i32, i32) {
    %c0_i32 = arith.constant 0 : i32
    %c0_i32_0 = arith.constant 0 : i32
    %c0_i32_1 = arith.constant 0 : i32
    return %c0_i32, %c0_i32_0 : i32, i32
  }
  func.func @transform_7(%arg0: i32) -> (i32, i32) {
    %c0_i32 = arith.constant 0 : i32
    %c0_i32_0 = arith.constant 0 : i32
    %c0_i32_1 = arith.constant 0 : i32
    return %c0_i32, %c0_i32_0 : i32, i32
  }
  func.func @transform_8(%arg0: i32) -> (i32, i32) {
    %c0_i32 = arith.constant 0 : i32
    %c0_i32_0 = arith.constant 0 : i32
    %c0_i32_1 = arith.constant 0 : i32
    return %c0_i32, %c0_i32_0 : i32, i32
  }
  func.func @transform_9(%arg0: i32) -> (i32, i32, i32) {
    %c0_i32 = arith.constant 0 : i32
    %c0_i32_0 = arith.constant 0 : i32
    %c0_i32_1 = arith.constant 0 : i32
    return %arg0, %c0_i32, %c0_i32_0 : i32, i32, i32
  }
}

</mosaic_0001>

<bundles_post_ra>
// kernel: tpu_custom_call.1
= control target key start
LH: loop header
LB: loop body
LE: loop exit
PB: predicated region body
PF: predicated region fallthrough
CT: control target
= control target key end

     0   :  { %14 = vsyncpa [#allocation3], 0  ;;  %s913_s0 = inlined_call_operand.hbm [shape: bf16[2,8,32], index: 0, kind: input, shape index: {}]   ;;  %s914_s1 = inlined_call_operand.hbm [shape: f32[2,1,8], index: 1, kind: input, shape index: {}]   ;;  %s915_s2 = inlined_call_operand.hbm [shape: bf16[32,32], index: 2, kind: input, shape index: {}]   ;;  %s916_s3 = inlined_call_operand.vmem [shape: f32[1,32], index: 3, kind: input, shape index: {}]   ;;  %s917_s4 = inlined_call_operand.hbm [shape: bf16[32,32], index: 4, kind: input, shape index: {}]   ;;  %s918_s5 = inlined_call_operand.vmem [shape: f32[1,32], index: 5, kind: input, shape index: {}]   ;;  %s919_s6 = inlined_call_operand.hbm [shape: bf16[32,128], index: 6, kind: input, shape index: {}]   ;;  %s920_s7 = inlined_call_operand.hbm [shape: bf16[32,128], index: 7, kind: input, shape index: {}]   ;;  %s921_s8 = inlined_call_operand.vmem [shape: f32[1,128], index: 8, kind: input, shape index: {}]   ;;  %s922_s9 = inlined_call_operand.hbm [shape: f32[1,2,128], index: 9, kind: output, shape index: {}]  }
   0x1   :  { %15 = vsyncpa [#allocation6], 0 }
   0x2   :  { %16 = vsyncpa [#allocation9], 0 }
   0x3   :  { %17 = vsyncpa [#allocation12], 0 }
   0x4   :  { %18 = vsyncpa [#allocation4], 0  ;;  %s777_s30 = smov [#allocation5]  }
   0x5   :  { %s36_s10 = sshll.u32 %s777_s30, 4  ;;  %s37_s10 = int_to_ptr.vmem [resolvable:$true] %s36_s10 }
   0x6   :  { %s635_s11 = scalar_lea.vmem %s37_s10, 32  ;;  %p640_p1 = scmp.lt.s32.totalorder %s37_s10, %s37_s10 }
   0x7   :  { %p636_p0 = scmp.ne.s32.totalorder %s37_s10, %s635_s11  ;;  %p641_p2 = scmp.lt.s32.totalorder %s635_s11, %s635_s11 }
   0x9   :  { %p642_p3 = por %p641_p2, %p640_p1 }
   0xb   :  { %p643_p4 = pnand %p642_p3, %p636_p0 }
   0xd   :  { %646 = shalt.err (!%p643_p4)
}
   0xe   :  { %s778_s12 = smov 16   ;;  %s779_s13 = smov 1  }
   0xf   :  { %42 = dma.hbm_to_vmem [thread:$0]  %s914_s1, 32, %s37_s10, [#allocation6], %s778_s12, %s778_s12, %s779_s13  }
  0x10   :  { %s780_s16 = smov [#allocation8]   ;;  %s781_s18 = smov [#allocation2]  }
  0x11   :  { %s62_s17 = sshll.u32 %s780_s16, 4  ;;  %s24_s19 = sshll.u32 %s781_s18, 4  ;;  %s63_s17 = int_to_ptr.vmem [resolvable:$true] %s62_s17  ;;  %s25_s19 = int_to_ptr.vmem [resolvable:$true] %s24_s19 }
  0x12   :  { %s655_s20 = scalar_lea.vmem %s63_s17, 256  ;;  %p660_p6 = scmp.lt.s32.totalorder %s63_s17, %s63_s17 }
  0x13   :  { %p656_p5 = scmp.ne.s32.totalorder %s63_s17, %s655_s20  ;;  %p661_p7 = scmp.lt.s32.totalorder %s655_s20, %s655_s20 }
  0x15   :  { %p662_p8 = por %p661_p7, %p660_p6 }
  0x17   :  { %p663_p9 = pnand %p662_p8, %p656_p5 }
  0x19   :  { %666 = shalt.err (!%p663_p9)
}
  0x1a   :  { %s782_s21 = smov 64   ;;  %s783_s22 = smov 4  }
  0x1b   :  { %68 = dma.hbm_to_vmem [thread:$0]  %s917_s4, 256, %s63_s17, [#allocation9], %s782_s21, %s782_s21, %s783_s22  }
  0x1c   :  { %s675_s1 = scalar_lea.vmem %s25_s19, 128  ;;  %p680_p11 = scmp.lt.s32.totalorder %s25_s19, %s25_s19 }
  0x1d   :  { %p676_p10 = scmp.ne.s32.totalorder %s25_s19, %s675_s1  ;;  %p681_p12 = scmp.lt.s32.totalorder %s675_s1, %s675_s1 }
  0x1f   :  { %p682_p13 = por %p681_p12, %p680_p11 }
  0x21   :  { %p683_p0 = pnand %p682_p13, %p676_p10 }
  0x23   :  { %686 = shalt.err (!%p683_p0)
}
  0x24   :  { %30 = dma.hbm_to_vmem [thread:$0]  %s913_s0, 128, %s25_s19, [#allocation3], %s782_s21, %s782_s21, %s783_s22  }
  0x25   :  { %s784_s27 = smov [#allocation7]   ;;  %s785_s29 = smov [#allocation10]  }
  0x26   :  { %s48_s28 = sshll.u32 %s784_s27, 4  ;;  %s76_s4 = sshll.u32 %s785_s29, 4  ;;  %s49_s28 = int_to_ptr.vmem [resolvable:$true] %s48_s28  ;;  %s77_s4 = int_to_ptr.vmem [resolvable:$true] %s76_s4 }
  0x27   :  { %s695_s30 = scalar_lea.vmem %s49_s28, 256  ;;  %p700_p2 = scmp.lt.s32.totalorder %s49_s28, %s49_s28 }
  0x28   :  { %p696_p1 = scmp.ne.s32.totalorder %s49_s28, %s695_s30  ;;  %p701_p3 = scmp.lt.s32.totalorder %s695_s30, %s695_s30 }
  0x2a   :  { %p702_p4 = por %p701_p3, %p700_p2 }
  0x2c   :  { %p703_p5 = pnand %p702_p4, %p696_p1 }
  0x2e   :  { %706 = shalt.err (!%p703_p5)
}
  0x2f   :  { %54 = dma.hbm_to_vmem [thread:$0]  %s915_s2, 256, %s49_s28, [#allocation6], %s782_s21, %s782_s21, %s783_s22  }
  0x30   :  { %s715_s0 = scalar_lea.vmem %s77_s4, 256  ;;  %p720_p7 = scmp.lt.s32.totalorder %s77_s4, %s77_s4 }
  0x31   :  { %p716_p6 = scmp.ne.s32.totalorder %s77_s4, %s715_s0  ;;  %p721_p8 = scmp.lt.s32.totalorder %s715_s0, %s715_s0 }
  0x33   :  { %p722_p9 = por %p721_p8, %p720_p7 }
  0x35   :  { %p723_p10 = pnand %p722_p9, %p716_p6 }
  0x37   :  { %726 = shalt.err (!%p723_p10)
}
  0x38   :  { %82 = dma.hbm_to_vmem [thread:$0]  %s919_s6, 256, %s77_s4, [#allocation9], %s782_s21, %s782_s21, %s783_s22  }
  0x39   :  { %s786_s14 = smov [#allocation11]  }
  0x3a   :  { %s88_s15 = sshll.u32 %s786_s14, 4  ;;  %s89_s15 = int_to_ptr.vmem [resolvable:$true] %s88_s15 }
  0x3b   :  { %s735_s16 = scalar_lea.vmem %s89_s15, 256  ;;  %p740_p12 = scmp.lt.s32.totalorder %s89_s15, %s89_s15 }
  0x3c   :  { %p736_p11 = scmp.ne.s32.totalorder %s89_s15, %s735_s16  ;;  %p741_p13 = scmp.lt.s32.totalorder %s735_s16, %s735_s16 }
  0x3e   :  { %p742_p0 = por %p741_p13, %p740_p12 }
  0x40   :  { %p743_p1 = pnand %p742_p0, %p736_p11 }
  0x42   :  { %746 = shalt.err (!%p743_p1)
}
  0x43   :  { %94 = dma.hbm_to_vmem [thread:$0]  %s920_s7, 256, %s89_s15, [#allocation12], %s782_s21, %s782_s21, %s783_s22  }
  0x44   :  { %767 = dma.done.wait [#allocation3], 128  }
  0x45   :  { %768 = vsyncadd [#allocation3], 4294967168 }
  0x46   :  { %769 = dma.done.wait [#allocation6], 288  }
  0x47   :  { %770 = vsyncadd [#allocation6], 4294967008 }
  0x48   :  { %771 = dma.done.wait [#allocation9], 512  }
  0x49   :  { %772 = vsyncadd [#allocation9], 4294966784 }
  0x4a   :  { %773 = dma.done.wait [#allocation12], 256  }
  0x4b   :  { %774 = vsyncadd [#allocation12], 4294967040  ;;  %v787_v0 = vmov 0.0   ;;  %vm788_vm0 = vmmov 0   ;;  %v614_v1 = vld [vmem:[#allocation7 + $0x8] sm:$0xff]   ;;  %v615_v2 = vld [vmem:[#allocation7] sm:$0xff]  }
  0x4c   :  { %557 = vmatprep.subr.bf16.mxu0 %v787_v0  ;;  %561 = vmatprep.mubr.msk.bf16.mxu0 %vm788_vm0, %v787_v0  ;;  %v616_v3 = vld [vmem:[#allocation2] sm:$0xff]   ;;  %vm146_vm1 = vcmask 261120   ;;  %vm203_vm2 = vcmask 1043456   ;;  %v195_v12 = vld [vmem:[#allocation5] sm:$0x1]  ;;  %vm199_vm3 = vcmask 64512  }
  0x4d   :  { %565 = vmatprep.subr.bf16.mxu1 %v787_v0  ;;  %567 = vmatprep.mubr.msk.bf16.mxu1 %vm788_vm0, %v787_v0  ;;  %v523_v4 = vld [vmem:[%s916_s3] ss:$0 sm:$0xff]  ;;  %v197_v15 = vpack.c.bf16 %v195_v12, %v195_v12  ;;  %v196_v20 = vld [vmem:[#allocation5 + $0x1] sm:$0x1]  ;;  %vm311_vm4 = vcmask 1041409   ;;  %v619_v41 = vld [vmem:[#allocation10 + $0x8] sm:$0xff]  }
  0x4e   :  { %558 = vmatpush3.bf16.msra.mxu0 %v614_v1  ;;  %v198_v23 = vpack.c.bf16 %v196_v20, %v196_v20  ;;  %v617_v25 = vld [vmem:[#allocation8 + $0x8] sm:$0xff]   ;;  %v618_v26 = vld [vmem:[#allocation8] sm:$0xff]   ;;  %v620_v43 = vld [vmem:[#allocation10] sm:$0xff]   ;;  %s789_s21 = smov [#allocation13]  }
  0x4f   :  { %559 = vmatprep.subr.bf16.mxu0 %v787_v0  ;;  %v621_v45 = vld [vmem:[#allocation11 + $0x8] sm:$0xff]   ;;  %v622_v46 = vld [vmem:[#allocation11] sm:$0xff]  }
  0x50   :  { %v530_v47 = vld [vmem:[%s918_s5] ss:$0 sm:$0xff]  ;;  %s511_s5 = sshll.u32 %s789_s21, 4  ;;  %s512_s5 = int_to_ptr.vmem [resolvable:$true] %s511_s5 }
  0x51   :  { %v540_v60 = vld [vmem:[%s921_s8] ss:$0 sm:$0xff]  ;;  %s747_s22 = scalar_lea.vmem %s512_s5, 32  ;;  %p752_p3 = scmp.lt.s32.totalorder %s512_s5, %s512_s5 }
  0x52   :  { %560 = vmatpush3.bf16.msra.mxu0 %v615_v2  ;;  %p748_p2 = scmp.ne.s32.totalorder %s512_s5, %s747_s22  ;;  %p753_p4 = scmp.lt.s32.totalorder %s747_s22, %s747_s22 }
  0x53   :  { %577 = vmatprep.subr.bf16.mxu0 %v787_v0 }
  0x54   :  { %p754_p5 = por %p753_p4, %p752_p3 }
  0x55   :  { %562 = vmatmul.mubr.msk.bf16.vlgmr.msra.gmra.mxu0 %vm146_vm1, %v616_v3 }
  0x56   :  { %581 = vmatprep.mubr.msk.bf16.mxu0 %vm788_vm0, %v787_v0  ;;  %578 = vmatpush3.bf16.msra.mxu0 %v617_v25  ;;  %p755_p6 = pnand %p754_p5, %p748_p2 }
  0x57   :  { %579 = vmatprep.subr.bf16.mxu0 %v787_v0 }
  0x5a   :  { %580 = vmatpush3.bf16.msra.mxu0 %v618_v26 }
  0x5b   :  { %593 = vmatprep.subr.bf16.mxu0 %v787_v0 }
 0x115   :  { %v184_v5 = vpop.f32.mrf.mxu0 }
 0x116   :  { %v185_v6 = vadd.f32 %v523_v4, %v184_v5 }
 0x117   :  { %v563_v7 = vpop.f32.mrf.mxu0 }
 0x118   :  { %623 = vtanh.f32 %v185_v6 }
 0x119   :  { %v187_v8 = vpop.f32.mrf.mxu0 }
 0x11a   :  { %v188_v9 = vadd.f32 %v523_v4, %v187_v8 }
 0x11b   :  { %v564_v10 = vpop.f32.mrf.mxu0 }
 0x11c   :  { %625 = vtanh.f32 %v188_v9 }
 0x125   :  { %v624_v11 = vpop.eup %623 }
 0x126   :  { %v193_v13 = vpack.c.bf16 %v624_v11, %v624_v11 }
 0x128   :  { %v205_v14 = vsel %vm203_vm2, %v193_v13, 0  ;;  %v436_v21 = vunpack.c.l.b16 %v193_v13 }
 0x129   :  { %v626_v16 = vpop.eup %625  ;;  %566 = vmatpush3.bf16.msra.mxu1 %v205_v14 }
 0x12a   :  { %v194_v17 = vpack.c.bf16 %v626_v16, %v626_v16  ;;  %571 = vmatprep.subr.bf16.mxu1 %v787_v0 }
 0x12c   :  { %v251_v18 = vsel %vm203_vm2, %v194_v17, 0  ;;  %v437_v19 = vunpack.c.l.b16 %v194_v17  ;;  %568 = vmatmul.mubr.msk.bf16.vlgmr.msra.gmra.mxu1 %vm199_vm3, %v197_v15 }
 0x12d   :  { %572 = vmatpush3.bf16.msra.mxu1 %v251_v18  ;;  %573 = vmatprep.mubr.msk.bf16.mxu1 %vm788_vm0, %v787_v0 }
 0x12e   :  { %v438_v22 = vrot.slane %v437_v19, 7  ;;  %585 = vmatprep.subr.bf16.mxu1 %v787_v0 }
 0x130   :  { %v439_v24 = vsel %vm311_vm4, %v438_v22, %v436_v21 }
 0x131   :  { %v440_v44 = vpack.c.b16 %v439_v24, %v439_v24 }
 0x134   :  { %574 = vmatmul.mubr.msk.bf16.vlgmr.msra.gmra.mxu1 %vm199_vm3, %v198_v23 }
 0x135   :  { %589 = vmatprep.mubr.msk.bf16.mxu1 %vm788_vm0, %v787_v0  ;;  %586 = vmatpush3.bf16.msra.mxu1 %v621_v45 }
 0x136   :  { %587 = vmatprep.subr.bf16.mxu1 %v787_v0 }
 0x139   :  { %588 = vmatpush3.bf16.msra.mxu1 %v622_v46 }
 0x1ec   :  { %v241_v27 = vpop.f32.mrf.mxu1 }
 0x1ed   :  { %v293_v32 = vpack.c.bf16 %v241_v27, %v241_v27 }
 0x1ee   :  { %v569_v28 = vpop.f32.mrf.mxu1 }
 0x1ef   :  { %v308_v37 = vunpack.c.l.b16 %v293_v32 }
 0x1f0   :  { %v244_v29 = vpop.f32.mrf.mxu1 }
 0x1f2   :  { %v570_v30 = vpop.f32.mrf.mxu1 }
 0x1f4   :  { %v287_v31 = vpop.f32.mrf.mxu1 }
 0x1f5   :  { %v294_v33 = vpack.c.bf16 %v287_v31, %v287_v31 }
 0x1f6   :  { %v575_v34 = vpop.f32.mrf.mxu1 }
 0x1f7   :  { %v309_v35 = vunpack.c.l.b16 %v294_v33 }
 0x1f8   :  { %v290_v36 = vpop.f32.mrf.mxu1 }
 0x1f9   :  { %v310_v38 = vrot.slane %v309_v35, 7 }
 0x1fa   :  { %v576_v39 = vpop.f32.mrf.mxu1 }
 0x1fb   :  { %v312_v40 = vsel %vm311_vm4, %v310_v38, %v308_v37 }
 0x1fc   :  { %v313_v42 = vpack.c.b16 %v312_v40, %v312_v40 }
 0x1fe   :  { %582 = vmatmul.mubr.msk.bf16.vlgmr.msra.gmra.mxu0 %vm146_vm1, %v313_v42 }
 0x1ff   :  { %594 = vmatpush3.bf16.msra.mxu0 %v619_v41  ;;  %597 = vmatprep.mubr.msk.bf16.mxu0 %vm788_vm0, %v787_v0 }
 0x200   :  { %595 = vmatprep.subr.bf16.mxu0 %v787_v0 }
 0x203   :  { %596 = vmatpush3.bf16.msra.mxu0 %v620_v43 }
 0x206   :  { %598 = vmatmul.mubr.msk.bf16.vlgmr.msra.gmra.mxu0 %vm146_vm1, %v440_v44 }
 0x2be   :  { %v363_v48 = vpop.f32.mrf.mxu0 }
 0x2bf   :  { %v364_v49 = vadd.f32 %v530_v47, %v363_v48 }
 0x2c0   :  { %v583_v50 = vpop.f32.mrf.mxu0 }
 0x2c1   :  { %v369_v51 = vmax.f32 %v364_v49, 0.0 }
 0x2c2   :  { %v366_v52 = vpop.f32.mrf.mxu0 }
 0x2c3   :  { %v374_v53 = vpack.c.bf16 %v369_v51, %v369_v51 }
 0x2c4   :  { %v584_v54 = vpop.f32.mrf.mxu0 }
 0x2c5   :  { %590 = vmatmul.mubr.msk.bf16.vlgmr.msra.gmra.mxu1 %vm146_vm1, %v374_v53 }
 0x2c6   :  { %v490_v55 = vpop.f32.mrf.mxu0 }
 0x2c8   :  { %v599_v56 = vpop.f32.mrf.mxu0 }
 0x2ca   :  { %v493_v57 = vpop.f32.mrf.mxu0 }
 0x2cc   :  { %v600_v58 = vpop.f32.mrf.mxu0 }
 0x385   :  { %v428_v59 = vpop.f32.mrf.mxu1 }
 0x386   :  { %v491_v61 = vadd.f32 %v490_v55, %v428_v59 }
 0x387   :  { %v591_v62 = vpop.f32.mrf.mxu1 }
 0x388   :  { %v503_v63 = vadd.f32 %v540_v60, %v491_v61 }
 0x389   :  { %v431_v0 = vpop.f32.mrf.mxu1 }
 0x38a   :  { %504 = vst [vmem:[#allocation13] sm:$0x3] %v503_v63 }
 0x38b   :  { %v592_v1 = vpop.f32.mrf.mxu1 }
 0x38c   :  { %758 = shalt.err (!%p755_p6)
}
 0x38d   :  { %514 = dma.vmem_to_hbm [thread:$0]  %s512_s5, 32, %s922_s9, [#allocation4]  }
 0x38e   :  { %775 = dma.done.wait [#allocation4], 32  }
 0x38f   :  { %776 = vsyncadd [#allocation4], 4294967264 }
 0x390   :  { %518 = vsyncpa [#allocation3], 1 }
 0x391   :  { %519 = vsyncpa [#allocation6], 1 }
 0x392   :  { %520 = vsyncpa [#allocation9], 1 }
 0x393   :  { %521 = vsyncpa [#allocation12], 1 }
 0x394   :  { %522 = vsyncpa [#allocation4], 1 }

</bundles_post_ra>
